<compile_context>
chip_gen: v6e
topology: v6e:2x2x1
jax: 0.10.0
libtpu: 0.0.40
codegen_flags: <defaults>
</compile_context>

<pallas_src>
from functools import partial

import jax
import jax.numpy as jnp
from jax.experimental import pallas as pl
from jax.experimental.pallas import tpu as pltpu

_LANES = 128
_TARGET_ROWS = 8192                 # 8192 x 128 f32 = 4 MiB per input block
_VMEM_LIMIT = 32 * 1024 * 1024      # double-buffered 4 MiB blocks fit easily


# --------------------------------------------------------------------------
# Elementwise loss definitions:  loss == mean(f(x)) over all elements.
# --------------------------------------------------------------------------
def _elementwise_fn(gan_type, target_is_real, is_disc,
                    real_label_val, fake_label_val):
    if gan_type == 'vanilla':
        t = real_label_val if target_is_real else fake_label_val
        # BCEWithLogitsLoss (stable form): max(x,0) - x*t + log1p(exp(-|x|))
        return lambda x: (jnp.maximum(x, 0.0) - x * t
                          + jnp.log1p(jnp.exp(-jnp.abs(x))))
    if gan_type == 'lsgan':
        t = real_label_val if target_is_real else fake_label_val
        return lambda x: (x - t) * (x - t)
    if gan_type == 'wgan':
        return (lambda x: -x) if target_is_real else (lambda x: x)
    if gan_type == 'wgan_softplus':
        # numerically stable softplus: max(x,0) + log1p(exp(-|x|))
        sp = lambda x: jnp.maximum(x, 0.0) + jnp.log1p(jnp.exp(-jnp.abs(x)))
        return (lambda x: sp(-x)) if target_is_real else sp
    if gan_type == 'hinge':
        if is_disc:
            if target_is_real:
                return lambda x: jnp.maximum(1.0 - x, 0.0)   # relu(1 - x)
            return lambda x: jnp.maximum(1.0 + x, 0.0)       # relu(1 + x)
        return lambda x: -x                                   # -mean(x)
    raise NotImplementedError(f'GAN type {gan_type} is not implemented.')


# --------------------------------------------------------------------------
# TensorCore count: only enable the 2-way core split on multi-TC chips (v7x).
# --------------------------------------------------------------------------
_NUM_TC_CACHE = None


def _tensorcores_per_chip():
    global _NUM_TC_CACHE
    if _NUM_TC_CACHE is not None:
        return _NUM_TC_CACHE
    cores = 1
    try:
        info = pltpu.get_tpu_info()
        for attr in ("num_cores", "num_tensorcores", "tensorcores_per_chip",
                     "tensor_cores_per_chip", "cores_per_chip"):
            v = getattr(info, attr, None)
            if v is not None:
                v = int(v)
                if 1 <= v <= 8:
                    cores = v
                    break
    except Exception:
        cores = 1
    if cores == 1:
        try:
            if "v7" in jax.devices()[0].device_kind.lower():
                cores = 2
        except Exception:
            pass
    _NUM_TC_CACHE = cores
    return cores


# --------------------------------------------------------------------------
# Kernels
# --------------------------------------------------------------------------
def _gan_tile_kernel(x_ref, o_ref, acc_ref, *, elem_fn, rows_per_tile,
                     tiles_per_core, num_full_tiles, n_rows, needs_mask):
    """Multi-tile reduction; rows_per_tile is a multiple of 8."""
    c = pl.program_id(0)          # TensorCore-split axis ("parallel")
    j = pl.program_id(1)          # tile index within this core ("arbitrary")
    sub = rows_per_tile // 8

    @pl.when(j == 0)
    def _():
        acc_ref[...] = jnp.zeros_like(acc_ref)

    x = x_ref[...].astype(jnp.float32)          # (rows_per_tile, 128)

    if needs_mask:
        tile_idx = c * tiles_per_core + j

        # Full tiles: unmasked fast path (no iota/compare/select).
        @pl.when(tile_idx < num_full_tiles)
        def _():
            acc_ref[...] += jnp.sum(
                elem_fn(x.reshape(sub, 8, _LANES)), axis=0)

        # Ragged edge tile / duplicated (clamped) tail tile: mask the inputs
        # to 0 BEFORE elem_fn (keeps transcendentals finite) and mask again
        # after, so nothing out-of-range reaches the accumulator.
        @pl.when(tile_idx >= num_full_tiles)
        def _():
            row = (tile_idx * rows_per_tile
                   + jax.lax.broadcasted_iota(jnp.int32, x.shape, 0))
            valid = row < n_rows
            xm = jnp.where(valid, x, 0.0)
            vals = jnp.where(valid, elem_fn(xm), 0.0)
            acc_ref[...] += jnp.sum(vals.reshape(sub, 8, _LANES), axis=0)
    else:
        acc_ref[...] += jnp.sum(elem_fn(x.reshape(sub, 8, _LANES)), axis=0)

    @pl.when(j == pl.num_programs(1) - 1)
    def _():
        # Single cross-lane reduce + one lane-dense store per core range.
        o_ref[...] = jnp.full(o_ref.shape, jnp.sum(acc_ref[...]),
                              dtype=jnp.float32)


def _gan_single_tile_kernel(x_ref, o_ref, *, elem_fn):
    """Whole aligned prefix fits in one VMEM block (< _TARGET_ROWS rows)."""
    vals = elem_fn(x_ref[...].astype(jnp.float32))
    o_ref[...] = jnp.full(o_ref.shape, jnp.sum(vals), dtype=jnp.float32)


# --------------------------------------------------------------------------
# Wrapper: mean(elem_fn(x)) over all elements.
# --------------------------------------------------------------------------
def _pallas_mean_of(elem_fn, x, target_rows=_TARGET_ROWS, core_split=None):
    n = int(x.size)
    if n == 0:
        return jnp.float32(jnp.nan)

    target_rows = max(8, ((int(target_rows) + 7) // 8) * 8)

    flat = jnp.ravel(x)                         # free for a contiguous array
    n_rows = n // _LANES
    n_aligned = n_rows * _LANES
    tail = n - n_aligned

    # The <128-element ragged tail is summed exactly in plain JAX (tiny),
    # instead of padding + re-copying the whole flattened array in HBM.
    if tail:
        tail_sum = jnp.sum(elem_fn(flat[n_aligned:].astype(jnp.float32)))
    else:
        tail_sum = jnp.float32(0.0)

    if n_rows == 0:
        return tail_sum / jnp.float32(n)

    x2d = (flat if tail == 0 else flat[:n_aligned]).reshape(n_rows, _LANES)

    if n_rows < target_rows:
        # Single-tile path (also covers row counts that are not multiples of
        # 8, where the (8,128) accumulator reshape does not apply).
        partials = pl.pallas_call(
            partial(_gan_single_tile_kernel, elem_fn=elem_fn),
            out_shape=jax.ShapeDtypeStruct((8, _LANES), jnp.float32),
            grid=(1,),
            in_specs=[pl.BlockSpec((n_rows, _LANES), lambda i: (0, 0))],
            out_specs=pl.BlockSpec((8, _LANES), lambda i: (0, 0)),
            compiler_params=pltpu.CompilerParams(
                dimension_semantics=("arbitrary",)),
        )(x2d)
        return (partials[0, 0] + tail_sum) / jnp.float32(n)

    rows_per_tile = target_rows                  # multiple of 8 by construction
    num_tiles = pl.cdiv(n_rows, rows_per_tile)

    if core_split is None:
        core_split = _tensorcores_per_chip()
    num_cores = 2 if (core_split >= 2 and num_tiles >= 2) else 1
    tiles_per_core = pl.cdiv(num_tiles, num_cores)
    total_blocks = num_cores * tiles_per_core
    num_full_tiles = n_rows // rows_per_tile
    needs_mask = (total_blocks != num_full_tiles)

    kernel = partial(_gan_tile_kernel, elem_fn=elem_fn,
                     rows_per_tile=rows_per_tile,
                     tiles_per_core=tiles_per_core,
                     num_full_tiles=num_full_tiles,
                     n_rows=n_rows, needs_mask=needs_mask)

    def in_index(c, j):
        # Clamp so the rounded-up grid never issues an out-of-bounds block
        # DMA; any duplicated block (only possible on the 2-TC split with an
        # odd tile count) is fully masked out inside the kernel.
        return (jnp.minimum(c * tiles_per_core + j, num_tiles - 1), 0)

    partials = pl.pallas_call(
        kernel,
        out_shape=jax.ShapeDtypeStruct((num_cores, 8, _LANES), jnp.float32),
        grid=(num_cores, tiles_per_core),
        in_specs=[pl.BlockSpec((rows_per_tile, _LANES), in_index)],
        out_specs=pl.BlockSpec((1, 8, _LANES), lambda c, j: (c, 0, 0)),
        scratch_shapes=[pltpu.VMEM((8, _LANES), jnp.float32)],
        compiler_params=pltpu.CompilerParams(
            # TODO(synk): on v7x verify "parallel" really shards the leading
            # axis across both TensorCores; switch to CORE_PARALLEL if not.
            dimension_semantics=("parallel", "arbitrary"),
            vmem_limit_bytes=_VMEM_LIMIT),
    )(x2d)

    total = jnp.sum(partials[:, 0, 0]) + tail_sum
    return total / jnp.float32(n)


# --------------------------------------------------------------------------
# Module
# --------------------------------------------------------------------------
class GANLoss:
    """JAX/Pallas port of the PyTorch GANLoss module.

    Supports gan_type in {'vanilla', 'lsgan', 'wgan', 'wgan_softplus',
    'hinge'}.  No learnable parameters (the module only holds label values).
    """

    def __init__(self, gan_type, real_label_val=1.0, fake_label_val=0.0):
        if gan_type not in ('vanilla', 'lsgan', 'wgan', 'wgan_softplus',
                            'hinge'):
            raise NotImplementedError(
                f'GAN type {gan_type} is not implemented.')
        self.gan_type = gan_type
        self.real_label_val = float(real_label_val)
        self.fake_label_val = float(fake_label_val)

    def __call__(self, x, target_is_real, is_disc=False):
        elem_fn = _elementwise_fn(self.gan_type, bool(target_is_real),
                                  bool(is_disc), self.real_label_val,
                                  self.fake_label_val)
        return _pallas_mean_of(elem_fn, x)


# --------------------------------------------------------------------------
# Pure-JAX reference (mirrors the PyTorch forward) and tests
# --------------------------------------------------------------------------
def _reference_loss(gan_type, x, target_is_real, is_disc,
                    real_val=1.0, fake_val=0.0):
    xf = x.astype(jnp.float32)
    if gan_type == 'hinge':
        if is_disc:
            xi = -xf if target_is_real else xf
            return jnp.mean(jax.nn.relu(1.0 + xi))
        return -jnp.mean(xf)
    if gan_type == 'wgan':
        return -jnp.mean(xf) if target_is_real else jnp.mean(xf)
    if gan_type == 'wgan_softplus':
        return (jnp.mean(jax.nn.softplus(-xf)) if target_is_real
                else jnp.mean(jax.nn.softplus(xf)))
    t = real_val if target_is_real else fake_val
    if gan_type == 'lsgan':
        return jnp.mean((xf - t) ** 2)
    # vanilla: BCEWithLogits
    return jnp.mean(jnp.maximum(xf, 0.0) - xf * t
                    + jnp.log1p(jnp.exp(-jnp.abs(xf))))


if __name__ == "__main__":
    key = jax.random.PRNGKey(0)
    # Discriminator-style logits map: N=2, C=4, H=16, W=16 (NCHW convention).
    x = jax.random.normal(key, (2, 4, 16, 16), dtype=jnp.float32)

    cases = [
        ('vanilla', True, False),
        ('vanilla', False, True),
        ('lsgan', True, False),
        ('wgan', False, False),
        ('wgan_softplus', True, False),
        ('hinge', True, True),
        ('hinge', False, True),
        ('hinge', True, False),
    ]
    for gan_type, target_is_real, is_disc in cases:
        got = jax.block_until_ready(GANLoss(gan_type)(x, target_is_real,
                                                      is_disc))
        want = _reference_loss(gan_type, x, target_is_real, is_disc)
        assert jnp.isfinite(got), (gan_type, got)
        assert abs(float(got) - float(want)) < 1e-4, \
            (gan_type, float(got), float(want))

    # bf16 input: streamed at native width, upcast to f32 inside the kernel.
    x_bf16 = x.astype(jnp.bfloat16)
    got = jax.block_until_ready(GANLoss('vanilla')(x_bf16, True))
    want = _reference_loss('vanilla', x_bf16, True, False)
    assert abs(float(got) - float(want)) < 1e-3, ('bf16', float(got),
                                                  float(want))

    # Non-lane-aligned element count (2500 = 19 full rows + 68-element tail):
    # exercises the plain-JAX tail correction and, with a small target_rows,
    # the multi-tile grid path with a masked ragged edge tile.
    x_odd = jax.random.normal(jax.random.PRNGKey(1), (2, 5, 10, 25),
                              dtype=jnp.float32)
    for gan_type, target_is_real, is_disc in [('vanilla', True, False),
                                              ('hinge', False, True),
                                              ('lsgan', True, False)]:
        fn = _elementwise_fn(gan_type, target_is_real, is_disc, 1.0, 0.0)
        want = float(_reference_loss(gan_type, x_odd, target_is_real, is_disc))
        got_single = float(jax.block_until_ready(_pallas_mean_of(fn, x_odd)))
        got_tiled = float(jax.block_until_ready(
            _pallas_mean_of(fn, x_odd, target_rows=8)))
        assert abs(got_single - want) < 1e-4, (gan_type, 'single',
                                               got_single, want)
        assert abs(got_tiled - want) < 1e-4, (gan_type, 'tiled',
                                              got_tiled, want)

    # Forced 2-TensorCore-split path (runs serially but must stay correct on
    # 1-TC chips): even tile count (clean path) and odd tile count
    # (duplicated, fully-masked tail block).
    fn = _elementwise_fn('lsgan', True, False, 1.0, 0.0)
    for shp, seed in (((32, 128), 2), ((24, 128), 3)):
        xx = jax.random.normal(jax.random.PRNGKey(seed), shp, jnp.float32)
        want = float(_reference_loss('lsgan', xx, True, False))
        got = float(jax.block_until_ready(
            _pallas_mean_of(fn, xx, target_rows=8, core_split=2)))
        assert abs(got - want) < 1e-4, ('core-split', shp, got, want)

    print("KERNEL_OK")
</pallas_src>

<mosaic_0001>
module attributes {stable_mosaic.version = 11 : i64} {
  func.func @_gan_single_tile_kernel(%arg0: i32, %arg1: memref<16x128xf32, #tpu.memory_space<vmem>>, %arg2: memref<8x128xf32, #tpu.memory_space<vmem>>) attributes {dimension_semantics = [#tpu.dimension_semantics<arbitrary>], iteration_bounds = array<i64: 1>, scalar_prefetch = 0 : i64, scratch_operands = 0 : i64, tpu.core_type = #tpu.core_type<tc>, window_params = [{pipeline_mode = #tpu.pipeline_mode<synchronous>, transform_indices = @transform_0, window_bounds = array<i64: 16, 128>}, {pipeline_mode = #tpu.pipeline_mode<synchronous>, transform_indices = @transform_1, window_bounds = array<i64: 8, 128>}]} {
    %c0 = arith.constant 0 : index
    %c0_0 = arith.constant 0 : index
    %0 = vector.load %arg1[%c0, %c0_0] : memref<16x128xf32, #tpu.memory_space<vmem>>, vector<16x128xf32>
    %cst = arith.constant 0.000000e+00 : f32
    %1 = vector.broadcast %cst : f32 to vector<16x128xf32>
    %2 = arith.maximumf %0, %1 : vector<16x128xf32>
    %cst_1 = arith.constant 1.000000e+00 : f32
    %3 = vector.broadcast %cst_1 : f32 to vector<16x128xf32>
    %4 = arith.mulf %0, %3 : vector<16x128xf32>
    %5 = arith.subf %2, %4 : vector<16x128xf32>
    %6 = math.absf %0 : vector<16x128xf32>
    %cst_2 = arith.constant 0.000000e+00 : f32
    %7 = vector.broadcast %cst_2 : f32 to vector<16x128xf32>
    %8 = arith.subf %7, %6 : vector<16x128xf32>
    %9 = math.exp %8 : vector<16x128xf32>
    %10 = math.log1p %9 : vector<16x128xf32>
    %11 = arith.addf %5, %10 : vector<16x128xf32>
    %12 = vector.shape_cast %11 : vector<16x128xf32> to vector<1x16x128xf32>
    %cst_3 = arith.constant dense<0.000000e+00> : vector<1xf32>
    %13 = vector.multi_reduction <add>, %12, %cst_3 [1, 2] : vector<1x16x128xf32> to vector<1xf32>
    %14 = vector.shape_cast %13 : vector<1xf32> to vector<1x1x1xf32>
    %15 = vector.extract %14[0, 0, 0] : f32 from vector<1x1x1xf32>
    %16 = vector.broadcast %15 : f32 to vector<8x128xf32>
    %c0_4 = arith.constant 0 : index
    %c0_5 = arith.constant 0 : index
    %17 = vector.load %arg2[%c0_4, %c0_5] : memref<8x128xf32, #tpu.memory_space<vmem>>, vector<8x128xf32>
    tpu.vector_store %arg2[%c0_4, %c0_5], %16 {strides = array<i32>} : memref<8x128xf32, #tpu.memory_space<vmem>>, vector<8x128xf32>,
    return
  }
  func.func @transform_0(%arg0: i32) -> (i32, i32) {
    %c0_i32 = arith.constant 0 : i32
    %c0_i32_0 = arith.constant 0 : i32
    %c0_i32_1 = arith.constant 0 : i32
    return %c0_i32, %c0_i32_0 : i32, i32
  }
  func.func @transform_1(%arg0: i32) -> (i32, i32) {
    %c0_i32 = arith.constant 0 : i32
    %c0_i32_0 = arith.constant 0 : i32
    %c0_i32_1 = arith.constant 0 : i32
    return %c0_i32, %c0_i32_0 : i32, i32
  }
}

</mosaic_0001>

<bundles_post_ra>
// kernel: tpu_custom_call.1
= control target key start
LH: loop header
LB: loop body
LE: loop exit
PB: predicated region body
PF: predicated region fallthrough
CT: control target
= control target key end

     0   :  { %6 = vsyncpa [#allocation3], 0  ;;  %s162_s0 = inlined_call_operand.hbm [shape: f32[16,128], index: 0, kind: input, shape index: {}]   ;;  %s163_s1 = inlined_call_operand.hbm [shape: f32[8,128], index: 1, kind: output, shape index: {}]  }
   0x1   :  { %7 = vsyncpa [#allocation4], 0  ;;  %s142_s6 = smov [#allocation2]  }
   0x2   :  { %s13_s7 = sshll.u32 %s142_s6, 4  ;;  %s14_s7 = int_to_ptr.vmem [resolvable:$true] %s13_s7 }
   0x3   :  { %s106_s8 = scalar_lea.vmem %s14_s7, 256  ;;  %p111_p1 = scmp.lt.s32.totalorder %s14_s7, %s14_s7 }
   0x4   :  { %p107_p0 = scmp.ne.s32.totalorder %s14_s7, %s106_s8  ;;  %p112_p2 = scmp.lt.s32.totalorder %s106_s8, %s106_s8 }
   0x6   :  { %p113_p3 = por %p112_p2, %p111_p1 }
   0x8   :  { %p114_p4 = pnand %p113_p3, %p107_p0 }
   0xa   :  { %117 = shalt.err (!%p114_p4)
}
   0xb   :  { %s143_s9 = smov 128   ;;  %s144_s10 = smov 8  }
   0xc   :  { %19 = dma.hbm_to_vmem [thread:$0]  %s162_s0, 256, %s14_s7, [#allocation3], %s143_s9, %s143_s9, %s144_s10  }
   0xd   :  { %138 = dma.done.wait [#allocation3], 256  }
   0xe   :  { %139 = vsyncadd [#allocation3], 4294967040  ;;  %v23_v0 = vld [vmem:[#allocation2] sm:$0xff]  ;;  %v24_v1 = vld [vmem:[#allocation2 + $0x8] sm:$0xff]  ;;  %s145_s0 = smov [#allocation5]  }
   0xf   :  { %v29_v2 = vand.u32 2147483647, %v23_v0  ;;  %v30_v3 = vand.u32 2147483647, %v24_v1  ;;  %v25_v15 = vmax.f32 %v23_v0, 0.0  ;;  %v26_v18 = vmax.f32 %v24_v1, 0.0 }
  0x10   :  { %s75_s13 = sshll.u32 %s145_s0, 4  ;;  %s76_s13 = int_to_ptr.vmem [resolvable:$true] %s75_s13 }
  0x11   :  { %v31_v4 = vsub.f32 0.0, %v29_v2  ;;  %v32_v5 = vsub.f32 0.0, %v30_v3  ;;  %v27_v22 = vsub.f32 %v25_v15, %v23_v0  ;;  %v28_v25 = vsub.f32 %v26_v18, %v24_v1  ;;  %s118_s15 = scalar_lea.vmem %s76_s13, 128  ;;  %p123_p6 = scmp.lt.s32.totalorder %s76_s13, %s76_s13 }
  0x12   :  { %p119_p5 = scmp.ne.s32.totalorder %s76_s13, %s118_s15  ;;  %p124_p7 = scmp.lt.s32.totalorder %s118_s15, %s118_s15 }
  0x13   :  { %v33_v6 = vmul.f32 1.442695, %v31_v4  ;;  %v35_v7 = vmul.f32 1.442695, %v32_v5 }
  0x14   :  { %p125_p8 = por %p124_p7, %p123_p6 }
  0x15   :  { %90 = vpow2.f32 %v33_v6 }
  0x16   :  { %92 = vpow2.f32 %v35_v7  ;;  %p126_p9 = pnand %p125_p8, %p119_p5 }
  0x22   :  { %v91_v8 = vpop.eup %90 }
  0x23   :  { %v93_v9 = vpop.eup %92  ;;  %v37_v10 = vadd.f32 1.0, %v91_v8  ;;  %v40_v12 = vmul.f32 -0.5, %v91_v8  ;;  %v43_v16 = vand.u32 2147483647, %v91_v8 }
  0x24   :  { %v46_v11 = vadd.f32 1.0, %v93_v9  ;;  %v49_v13 = vmul.f32 -0.5, %v93_v9  ;;  %v52_v19 = vand.u32 2147483647, %v93_v9 }
  0x25   :  { %94 = vlog2.f32 %v37_v10  ;;  %v41_v14 = vadd.f32 1.0, %v40_v12  ;;  %vm44_vm0 = vcmp.lt.f32.partialorder %v43_v16, 0.0004427343 }
  0x26   :  { %96 = vlog2.f32 %v46_v11  ;;  %v50_v17 = vadd.f32 1.0, %v49_v13  ;;  %vm53_vm1 = vcmp.lt.f32.partialorder %v52_v19, 0.0004427343 }
  0x27   :  { %v42_v20 = vmul.f32 %v91_v8, %v41_v14 }
  0x28   :  { %v51_v23 = vmul.f32 %v93_v9, %v50_v17 }
  0x32   :  { %v95_v21 = vpop.eup %94 }
  0x33   :  { %v97_v24 = vpop.eup %96  ;;  %v39_v26 = vmul.f32 0.6931472, %v95_v21 }
  0x34   :  { %v48_v27 = vmul.f32 0.6931472, %v97_v24 }
  0x35   :  { %v45_v28 = vsel %vm44_vm0, %v42_v20, %v39_v26 }
  0x36   :  { %v54_v29 = vsel %vm53_vm1, %v51_v23, %v48_v27  ;;  %v55_v30 = vadd.f32 %v45_v28, %v27_v22 }
  0x37   :  { %v56_v31 = vadd.f32 %v54_v29, %v28_v25 }
  0x39   :  { %v57_v32 = vadd.f32 %v56_v31, %v55_v30 }
  0x3b   :  { %58 = vadd.xlane.f32.xlu0 %v57_v32 }
  0xc4   :  { %v59_v33 = vpop.xlane.xlu0 %58 }
  0xc5   :  { %v60_v34 = vrot.slane %v59_v33, 4 }
  0xc7   :  { %v61_v35 = vadd.f32 %v60_v34, %v59_v33 }
  0xc9   :  { %v62_v36 = vrot.slane %v61_v35, 2 }
  0xcb   :  { %v63_v37 = vadd.f32 %v62_v36, %v61_v35 }
  0xcd   :  { %v64_v38 = vrot.slane %v63_v37, 1 }
  0xcf   :  { %v65_v39 = vadd.f32 %v64_v38, %v63_v37 }
  0xd1   :  { %84 = vpush %v65_v39 }
 0x102   :  { %s85_s14 = spop %84 }
 0x103   :  { %v67_v40 = vstv %s85_s14 }
 0x104   :  { %68 = vst [vmem:[#allocation5] sm:$0xff] %v67_v40 }
 0x105   :  { %129 = shalt.err (!%p126_p9)
}
 0x106   :  { %78 = dma.vmem_to_hbm [thread:$0]  %s76_s13, 128, %s163_s1, [#allocation4]  }
 0x107   :  { %140 = dma.done.wait [#allocation4], 128  }
 0x108   :  { %141 = vsyncadd [#allocation4], 4294967168 }
 0x109   :  { %82 = vsyncpa [#allocation3], 1 }
 0x10a   :  { %83 = vsyncpa [#allocation4], 1 }

</bundles_post_ra>
